<compile_context>
chip_gen: v7x
topology: tpu7x:2x2x1
jax: 0.10.0
libtpu: 0.0.40
codegen_flags: <defaults>
</compile_context>

<pallas_src>
import numpy as np
import jax
import jax.numpy as jnp
from jax import lax
from jax.experimental import pallas as pl
from jax.experimental.pallas import tpu as pltpu


# ----------------------------- Pallas kernel ------------------------------ #
def _make_rnn_kernel(T, B, H):
    """Kernel closure over static dims.  All fused 6H-wide tensors use the
    column layout [r_f | r_b | z_f | z_b | n_f | n_b] (each block H wide),
    so the sigmoid gates (r,z) occupy one contiguous 4H block and the tanh
    gate (n) another — per-step gate slices are plain static lane views."""
    H2, H4, H6 = 2 * H, 4 * H, 6 * H

    def kernel(x_ref,        # (T*B, 2D) rows are [x_t | x_{T-1-t}], time-major
               w_in_ref,     # (2D, 6H)  block-diag input->gates (both dirs)
               b_in_ref,     # (1, 6H)
               w_hh_ref,     # (2H, 6H)  block-diag hidden->gates (both dirs)
               b_hh_ref,     # (1, 6H)
               w_lab_ref,    # (2H, C)   hidden2label weight (transposed)
               b_lab_ref,    # (1, C)
               y_ref):       # (B, C)
        f32 = jnp.float32

        # ---- hoisted: one MXU matmul yields gate pre-activations for every
        # step and both directions (fwd reads x_t, bwd reads x_{T-1-t} thanks
        # to the paired input columns + block-diagonal w_in).
        gx_all = jnp.dot(x_ref[...], w_in_ref[...],
                         preferred_element_type=f32) + b_in_ref[...]   # (T*B, 6H)
        gx = [gx_all[t * B:(t + 1) * B, :] for t in range(T)]          # T x (B, 6H)

        # ---- hoisted loads / broadcasts (loop body only consumes values).
        w_hh = w_hh_ref[...]                                           # (2H, 6H)
        b_hh = jnp.broadcast_to(b_hh_ref[...], (B, H6))                # (B, 6H)

        # ---- recurrence: h = [h_f | h_b] carried in registers.
        h = jnp.zeros((B, H2), f32)
        # running max initialised to 0  =>  final m == relu(max_t h_t)
        m = jnp.zeros((B, H2), f32)

        for t in range(T):                  # fully unrolled (T small, static)
            g_in = gx[t]                                               # (B, 6H)
            # single fused hidden-state matmul for both directions.
            gh = jnp.dot(h, w_hh, preferred_element_type=f32) + b_hh   # (B, 6H)
            # PyTorch GRU gate math (r, z, n order).
            rz = jax.nn.sigmoid(g_in[:, :H4] + gh[:, :H4])             # (B, 4H)
            r = rz[:, :H2]
            z = rz[:, H2:H4]
            n = jnp.tanh(g_in[:, H4:] + r * gh[:, H4:])                # (B, 2H)
            h = (1.0 - z) * n + z * h
            m = jnp.maximum(m, h)

        # max_pool1d over time (+relu already folded in)  ->  linear
        y_ref[...] = jnp.dot(m, w_lab_ref[...],
                             preferred_element_type=f32) + b_lab_ref[...]

    return kernel


# ---------------------- host-side weight fusion ---------------------------- #
def _fuse_params(p):
    """Build fused / block-diagonal weights from PyTorch-layout GRU params."""
    H = p["w_hh_f"].shape[1]
    D = p["w_ih_f"].shape[1]

    def g(a, k):                       # gate slice k of a (3H, ...) tensor
        return a[k * H:(k + 1) * H]

    ZD = jnp.zeros((D, H), jnp.float32)
    ZH = jnp.zeros((H, H), jnp.float32)
    in_blocks, hh_blocks, b_in_cols, b_hh_cols = [], [], [], []
    for k in range(3):                 # PyTorch gate order: r, z, n
        in_blocks.append(jnp.concatenate([
            jnp.concatenate([g(p["w_ih_f"], k).T, ZD], axis=1),   # rows = x_t
            jnp.concatenate([ZD, g(p["w_ih_b"], k).T], axis=1),   # rows = x_{T-1-t}
        ], axis=0))                                               # (2D, 2H)
        hh_blocks.append(jnp.concatenate([
            jnp.concatenate([g(p["w_hh_f"], k).T, ZH], axis=1),   # rows = h_f
            jnp.concatenate([ZH, g(p["w_hh_b"], k).T], axis=1),   # rows = h_b
        ], axis=0))                                               # (2H, 2H)
        b_in_cols += [g(p["b_ih_f"], k), g(p["b_ih_b"], k)]
        b_hh_cols += [g(p["b_hh_f"], k), g(p["b_hh_b"], k)]

    w_in = jnp.concatenate(in_blocks, axis=1)            # (2D, 6H)
    w_hh = jnp.concatenate(hh_blocks, axis=1)            # (2H, 6H)
    b_in = jnp.concatenate(b_in_cols).reshape(1, -1)     # (1, 6H)
    b_hh = jnp.concatenate(b_hh_cols).reshape(1, -1)     # (1, 6H)
    w_lab = p["w_lab"].T                                 # (2H, C), rows [fwd|bwd]
    b_lab = p["b_lab"].reshape(1, -1)                    # (1, C)
    return w_in, b_in, w_hh, b_hh, w_lab, b_lab


def rnn_pallas_forward(tokens, p):
    """tokens: (B, T) int32 token ids.  p: dict of PyTorch-layout parameters."""
    B, T = tokens.shape
    D = p["embed_w"].shape[1]
    H = p["w_hh_f"].shape[1]
    C = p["w_lab"].shape[0]

    # --- glue (plain JAX): embedding lookup + direction pairing; dropout is
    # identity in eval mode.
    # TODO(synk): training-time dropout (embed + GRU inter-layer) not modeled.
    x = jnp.take(p["embed_w"], tokens.T, axis=0).astype(jnp.float32)  # (T, B, D)
    x_pair = jnp.concatenate([x, x[::-1]], axis=-1)                   # (T, B, 2D)
    x_pair = x_pair.reshape(T * B, 2 * D)                             # (T*B, 2D)

    w_in, b_in, w_hh, b_hh, w_lab, b_lab = _fuse_params(p)

    vmem = pl.BlockSpec(memory_space=pltpu.MemorySpace.VMEM)
    # TODO(synk): at real T/B/D, stream time tiles with a grid + BlockSpec
    # index_map (v7x 64 MiB VMEM) and add a parallel batch grid axis; the toy
    # shapes here fit whole-array VMEM residency in a single invocation.
    y = pl.pallas_call(
        _make_rnn_kernel(T, B, H),
        out_shape=jax.ShapeDtypeStruct((B, C), jnp.float32),
        in_specs=[vmem] * 7,
        out_specs=vmem,
    )(x_pair, w_in, b_in, w_hh, b_hh, w_lab, b_lab)
    return y


# ------------------------- pure-JAX reference ------------------------------ #
def _gru_ref(x, h0, w_ih, w_hh, b_ih, b_hh):
    H = w_hh.shape[1]

    def step(h, x_t):
        gx = x_t @ w_ih.T + b_ih
        gh = h @ w_hh.T + b_hh
        r = jax.nn.sigmoid(gx[:, :H] + gh[:, :H])
        z = jax.nn.sigmoid(gx[:, H:2 * H] + gh[:, H:2 * H])
        n = jnp.tanh(gx[:, 2 * H:] + r * gh[:, 2 * H:])
        h = (1.0 - z) * n + z * h
        return h, h

    _, hs = lax.scan(step, h0, x)
    return hs                                            # (T, B, H)


def rnn_ref_forward(tokens, p):
    B, T = tokens.shape
    H = p["w_hh_f"].shape[1]
    x = jnp.take(p["embed_w"], tokens.T, axis=0)         # (T, B, D)
    h0 = jnp.zeros((B, H), jnp.float32)
    hs_f = _gru_ref(x, h0, p["w_ih_f"], p["w_hh_f"], p["b_ih_f"], p["b_hh_f"])
    hs_b = _gru_ref(x[::-1], h0, p["w_ih_b"], p["w_hh_b"], p["b_ih_b"], p["b_hh_b"])
    pooled = jnp.concatenate([hs_f.max(axis=0), hs_b.max(axis=0)], axis=-1)
    pooled = jnp.maximum(pooled, 0.0)
    return pooled @ p["w_lab"].T + p["b_lab"]


# --------------------------------- main ------------------------------------ #
if __name__ == "__main__":
    # small shapes consistent with the module's forward
    VOCAB_SIZE = 20
    NUM_EMBEDDINGS = VOCAB_SIZE + 2
    WORD_DIM = 32       # WORD_DIM
    HIDDEN = 32         # HIDDEN_SIZE
    CLASS_SIZE = 4
    BATCH = 2           # BATCH_SIZE
    SEQ = 8             # MAX_SENT_LEN
    # HIDDEN_LAYERS = 1 (single-layer bidirectional GRU)

    key = jax.random.PRNGKey(0)
    ks = jax.random.split(key, 12)
    scale = 1.0 / np.sqrt(HIDDEN)

    embed_w = jax.random.normal(ks[0], (NUM_EMBEDDINGS, WORD_DIM), jnp.float32)
    embed_w = embed_w.at[VOCAB_SIZE + 1].set(0.0)   # padding_idx = VOCAB_SIZE + 1

    def u(k, shape):
        return jax.random.uniform(k, shape, jnp.float32, -scale, scale)

    params = dict(
        embed_w=embed_w,
        w_ih_f=u(ks[1], (3 * HIDDEN, WORD_DIM)),
        w_hh_f=u(ks[2], (3 * HIDDEN, HIDDEN)),
        b_ih_f=u(ks[3], (3 * HIDDEN,)),
        b_hh_f=u(ks[4], (3 * HIDDEN,)),
        w_ih_b=u(ks[5], (3 * HIDDEN, WORD_DIM)),
        w_hh_b=u(ks[6], (3 * HIDDEN, HIDDEN)),
        b_ih_b=u(ks[7], (3 * HIDDEN,)),
        b_hh_b=u(ks[8], (3 * HIDDEN,)),
        w_lab=u(ks[9], (CLASS_SIZE, 2 * HIDDEN)),
        b_lab=u(ks[10], (CLASS_SIZE,)),
    )

    tokens = jax.random.randint(ks[11], (BATCH, SEQ), 0, NUM_EMBEDDINGS, jnp.int32)

    y = rnn_pallas_forward(tokens, params)
    y = jax.block_until_ready(y)

    y_ref = jax.block_until_ready(rnn_ref_forward(tokens, params))
    assert y.shape == (BATCH, CLASS_SIZE)
    assert np.allclose(np.asarray(y), np.asarray(y_ref), rtol=1e-2, atol=1e-2), (
        "Pallas output diverges from reference")

    print("KERNEL_OK")
</pallas_src>

<mosaic_0001>
module attributes {stable_mosaic.version = 11 : i64} {
  func.func @kernel(%arg0: memref<16x64xf32, #tpu.memory_space<vmem>>, %arg1: memref<64x192xf32, #tpu.memory_space<vmem>>, %arg2: memref<1x192xf32, #tpu.memory_space<vmem>>, %arg3: memref<64x192xf32, #tpu.memory_space<vmem>>, %arg4: memref<1x192xf32, #tpu.memory_space<vmem>>, %arg5: memref<64x4xf32, #tpu.memory_space<vmem>>, %arg6: memref<1x4xf32, #tpu.memory_space<vmem>>, %arg7: memref<2x4xf32, #tpu.memory_space<vmem>>) attributes {dimension_semantics = [], scalar_prefetch = 0 : i64, scratch_operands = 0 : i64, tpu.core_type = #tpu.core_type<tc>} {
    %c0 = arith.constant 0 : index
    %c0_0 = arith.constant 0 : index
    %0 = vector.load %arg0[%c0, %c0_0] : memref<16x64xf32, #tpu.memory_space<vmem>>, vector<16x64xf32>
    %c0_1 = arith.constant 0 : index
    %c0_2 = arith.constant 0 : index
    %1 = vector.load %arg1[%c0_1, %c0_2] : memref<64x192xf32, #tpu.memory_space<vmem>>, vector<64x192xf32>
    %cst = arith.constant dense<0.000000e+00> : vector<16x192xf32>
    %2 = tpu.matmul %0, %1, %cst {dimension_numbers = #tpu.dot_dimension_numbers<[1], [0], [0], [1], [0, 0, 1, 1], [], []>} : vector<16x64xf32>, vector<64x192xf32>, vector<16x192xf32> -> vector<16x192xf32>
    %c0_3 = arith.constant 0 : index
    %c0_4 = arith.constant 0 : index
    %3 = vector.load %arg2[%c0_3, %c0_4] : memref<1x192xf32, #tpu.memory_space<vmem>>, vector<1x192xf32>
    %4 = vector.broadcast %3 : vector<1x192xf32> to vector<16x192xf32>
    %5 = arith.addf %2, %4 : vector<16x192xf32>
    %6 = vector.extract_strided_slice %5 {offsets = [0, 0], sizes = [2, 192], strides = [1, 1]} : vector<16x192xf32> to vector<2x192xf32>
    %7 = vector.extract_strided_slice %5 {offsets = [2, 0], sizes = [2, 192], strides = [1, 1]} : vector<16x192xf32> to vector<2x192xf32>
    %8 = vector.extract_strided_slice %5 {offsets = [4, 0], sizes = [2, 192], strides = [1, 1]} : vector<16x192xf32> to vector<2x192xf32>
    %9 = vector.extract_strided_slice %5 {offsets = [6, 0], sizes = [2, 192], strides = [1, 1]} : vector<16x192xf32> to vector<2x192xf32>
    %10 = vector.extract_strided_slice %5 {offsets = [8, 0], sizes = [2, 192], strides = [1, 1]} : vector<16x192xf32> to vector<2x192xf32>
    %11 = vector.extract_strided_slice %5 {offsets = [10, 0], sizes = [2, 192], strides = [1, 1]} : vector<16x192xf32> to vector<2x192xf32>
    %12 = vector.extract_strided_slice %5 {offsets = [12, 0], sizes = [2, 192], strides = [1, 1]} : vector<16x192xf32> to vector<2x192xf32>
    %13 = vector.extract_strided_slice %5 {offsets = [14, 0], sizes = [2, 192], strides = [1, 1]} : vector<16x192xf32> to vector<2x192xf32>
    %c0_5 = arith.constant 0 : index
    %c0_6 = arith.constant 0 : index
    %14 = vector.load %arg3[%c0_5, %c0_6] : memref<64x192xf32, #tpu.memory_space<vmem>>, vector<64x192xf32>
    %c0_7 = arith.constant 0 : index
    %c0_8 = arith.constant 0 : index
    %15 = vector.load %arg4[%c0_7, %c0_8] : memref<1x192xf32, #tpu.memory_space<vmem>>, vector<1x192xf32>
    %16 = vector.shape_cast %15 : vector<1x192xf32> to vector<1x192xf32>
    %17 = vector.broadcast %16 : vector<1x192xf32> to vector<2x192xf32>
    %cst_9 = arith.constant 0.000000e+00 : f32
    %18 = vector.broadcast %cst_9 : f32 to vector<2x64xf32>
    %cst_10 = arith.constant 0.000000e+00 : f32
    %19 = vector.broadcast %cst_10 : f32 to vector<2x64xf32>
    %cst_11 = arith.constant dense<0.000000e+00> : vector<2x192xf32>
    %20 = tpu.matmul %18, %14, %cst_11 {dimension_numbers = #tpu.dot_dimension_numbers<[1], [0], [0], [1], [0, 0, 1, 1], [], []>} : vector<2x64xf32>, vector<64x192xf32>, vector<2x192xf32> -> vector<2x192xf32>
    %21 = arith.addf %20, %17 : vector<2x192xf32>
    %22 = vector.extract_strided_slice %6 {offsets = [0, 0], sizes = [2, 128], strides = [1, 1]} : vector<2x192xf32> to vector<2x128xf32>
    %23 = vector.extract_strided_slice %21 {offsets = [0, 0], sizes = [2, 128], strides = [1, 1]} : vector<2x192xf32> to vector<2x128xf32>
    %24 = arith.addf %22, %23 : vector<2x128xf32>
    %25 = arith.negf %24 : vector<2x128xf32>
    %26 = math.exp %25 : vector<2x128xf32>
    %cst_12 = arith.constant 1.000000e+00 : f32
    %27 = vector.broadcast %cst_12 : f32 to vector<2x128xf32>
    %28 = arith.addf %27, %26 : vector<2x128xf32>
    %29 = arith.divf %27, %28 : vector<2x128xf32>
    %30 = vector.extract_strided_slice %29 {offsets = [0, 0], sizes = [2, 64], strides = [1, 1]} : vector<2x128xf32> to vector<2x64xf32>
    %31 = vector.extract_strided_slice %29 {offsets = [0, 64], sizes = [2, 64], strides = [1, 1]} : vector<2x128xf32> to vector<2x64xf32>
    %32 = vector.extract_strided_slice %6 {offsets = [0, 128], sizes = [2, 64], strides = [1, 1]} : vector<2x192xf32> to vector<2x64xf32>
    %33 = vector.extract_strided_slice %21 {offsets = [0, 128], sizes = [2, 64], strides = [1, 1]} : vector<2x192xf32> to vector<2x64xf32>
    %34 = arith.mulf %30, %33 : vector<2x64xf32>
    %35 = arith.addf %32, %34 : vector<2x64xf32>
    %36 = math.tanh %35 : vector<2x64xf32>
    %cst_13 = arith.constant 1.000000e+00 : f32
    %37 = vector.broadcast %cst_13 : f32 to vector<2x64xf32>
    %38 = arith.subf %37, %31 : vector<2x64xf32>
    %39 = arith.mulf %38, %36 : vector<2x64xf32>
    %40 = arith.mulf %31, %18 : vector<2x64xf32>
    %41 = arith.addf %39, %40 : vector<2x64xf32>
    %42 = arith.maximumf %19, %41 : vector<2x64xf32>
    %cst_14 = arith.constant dense<0.000000e+00> : vector<2x192xf32>
    %43 = tpu.matmul %41, %14, %cst_14 {dimension_numbers = #tpu.dot_dimension_numbers<[1], [0], [0], [1], [0, 0, 1, 1], [], []>} : vector<2x64xf32>, vector<64x192xf32>, vector<2x192xf32> -> vector<2x192xf32>
    %44 = arith.addf %43, %17 : vector<2x192xf32>
    %45 = vector.extract_strided_slice %7 {offsets = [0, 0], sizes = [2, 128], strides = [1, 1]} : vector<2x192xf32> to vector<2x128xf32>
    %46 = vector.extract_strided_slice %44 {offsets = [0, 0], sizes = [2, 128], strides = [1, 1]} : vector<2x192xf32> to vector<2x128xf32>
    %47 = arith.addf %45, %46 : vector<2x128xf32>
    %48 = arith.negf %47 : vector<2x128xf32>
    %49 = math.exp %48 : vector<2x128xf32>
    %cst_15 = arith.constant 1.000000e+00 : f32
    %50 = vector.broadcast %cst_15 : f32 to vector<2x128xf32>
    %51 = arith.addf %50, %49 : vector<2x128xf32>
    %52 = arith.divf %50, %51 : vector<2x128xf32>
    %53 = vector.extract_strided_slice %52 {offsets = [0, 0], sizes = [2, 64], strides = [1, 1]} : vector<2x128xf32> to vector<2x64xf32>
    %54 = vector.extract_strided_slice %52 {offsets = [0, 64], sizes = [2, 64], strides = [1, 1]} : vector<2x128xf32> to vector<2x64xf32>
    %55 = vector.extract_strided_slice %7 {offsets = [0, 128], sizes = [2, 64], strides = [1, 1]} : vector<2x192xf32> to vector<2x64xf32>
    %56 = vector.extract_strided_slice %44 {offsets = [0, 128], sizes = [2, 64], strides = [1, 1]} : vector<2x192xf32> to vector<2x64xf32>
    %57 = arith.mulf %53, %56 : vector<2x64xf32>
    %58 = arith.addf %55, %57 : vector<2x64xf32>
    %59 = math.tanh %58 : vector<2x64xf32>
    %cst_16 = arith.constant 1.000000e+00 : f32
    %60 = vector.broadcast %cst_16 : f32 to vector<2x64xf32>
    %61 = arith.subf %60, %54 : vector<2x64xf32>
    %62 = arith.mulf %61, %59 : vector<2x64xf32>
    %63 = arith.mulf %54, %41 : vector<2x64xf32>
    %64 = arith.addf %62, %63 : vector<2x64xf32>
    %65 = arith.maximumf %42, %64 : vector<2x64xf32>
    %cst_17 = arith.constant dense<0.000000e+00> : vector<2x192xf32>
    %66 = tpu.matmul %64, %14, %cst_17 {dimension_numbers = #tpu.dot_dimension_numbers<[1], [0], [0], [1], [0, 0, 1, 1], [], []>} : vector<2x64xf32>, vector<64x192xf32>, vector<2x192xf32> -> vector<2x192xf32>
    %67 = arith.addf %66, %17 : vector<2x192xf32>
    %68 = vector.extract_strided_slice %8 {offsets = [0, 0], sizes = [2, 128], strides = [1, 1]} : vector<2x192xf32> to vector<2x128xf32>
    %69 = vector.extract_strided_slice %67 {offsets = [0, 0], sizes = [2, 128], strides = [1, 1]} : vector<2x192xf32> to vector<2x128xf32>
    %70 = arith.addf %68, %69 : vector<2x128xf32>
    %71 = arith.negf %70 : vector<2x128xf32>
    %72 = math.exp %71 : vector<2x128xf32>
    %cst_18 = arith.constant 1.000000e+00 : f32
    %73 = vector.broadcast %cst_18 : f32 to vector<2x128xf32>
    %74 = arith.addf %73, %72 : vector<2x128xf32>
    %75 = arith.divf %73, %74 : vector<2x128xf32>
    %76 = vector.extract_strided_slice %75 {offsets = [0, 0], sizes = [2, 64], strides = [1, 1]} : vector<2x128xf32> to vector<2x64xf32>
    %77 = vector.extract_strided_slice %75 {offsets = [0, 64], sizes = [2, 64], strides = [1, 1]} : vector<2x128xf32> to vector<2x64xf32>
    %78 = vector.extract_strided_slice %8 {offsets = [0, 128], sizes = [2, 64], strides = [1, 1]} : vector<2x192xf32> to vector<2x64xf32>
    %79 = vector.extract_strided_slice %67 {offsets = [0, 128], sizes = [2, 64], strides = [1, 1]} : vector<2x192xf32> to vector<2x64xf32>
    %80 = arith.mulf %76, %79 : vector<2x64xf32>
    %81 = arith.addf %78, %80 : vector<2x64xf32>
    %82 = math.tanh %81 : vector<2x64xf32>
    %cst_19 = arith.constant 1.000000e+00 : f32
    %83 = vector.broadcast %cst_19 : f32 to vector<2x64xf32>
    %84 = arith.subf %83, %77 : vector<2x64xf32>
    %85 = arith.mulf %84, %82 : vector<2x64xf32>
    %86 = arith.mulf %77, %64 : vector<2x64xf32>
    %87 = arith.addf %85, %86 : vector<2x64xf32>
    %88 = arith.maximumf %65, %87 : vector<2x64xf32>
    %cst_20 = arith.constant dense<0.000000e+00> : vector<2x192xf32>
    %89 = tpu.matmul %87, %14, %cst_20 {dimension_numbers = #tpu.dot_dimension_numbers<[1], [0], [0], [1], [0, 0, 1, 1], [], []>} : vector<2x64xf32>, vector<64x192xf32>, vector<2x192xf32> -> vector<2x192xf32>
    %90 = arith.addf %89, %17 : vector<2x192xf32>
    %91 = vector.extract_strided_slice %9 {offsets = [0, 0], sizes = [2, 128], strides = [1, 1]} : vector<2x192xf32> to vector<2x128xf32>
    %92 = vector.extract_strided_slice %90 {offsets = [0, 0], sizes = [2, 128], strides = [1, 1]} : vector<2x192xf32> to vector<2x128xf32>
    %93 = arith.addf %91, %92 : vector<2x128xf32>
    %94 = arith.negf %93 : vector<2x128xf32>
    %95 = math.exp %94 : vector<2x128xf32>
    %cst_21 = arith.constant 1.000000e+00 : f32
    %96 = vector.broadcast %cst_21 : f32 to vector<2x128xf32>
    %97 = arith.addf %96, %95 : vector<2x128xf32>
    %98 = arith.divf %96, %97 : vector<2x128xf32>
    %99 = vector.extract_strided_slice %98 {offsets = [0, 0], sizes = [2, 64], strides = [1, 1]} : vector<2x128xf32> to vector<2x64xf32>
    %100 = vector.extract_strided_slice %98 {offsets = [0, 64], sizes = [2, 64], strides = [1, 1]} : vector<2x128xf32> to vector<2x64xf32>
    %101 = vector.extract_strided_slice %9 {offsets = [0, 128], sizes = [2, 64], strides = [1, 1]} : vector<2x192xf32> to vector<2x64xf32>
    %102 = vector.extract_strided_slice %90 {offsets = [0, 128], sizes = [2, 64], strides = [1, 1]} : vector<2x192xf32> to vector<2x64xf32>
    %103 = arith.mulf %99, %102 : vector<2x64xf32>
    %104 = arith.addf %101, %103 : vector<2x64xf32>
    %105 = math.tanh %104 : vector<2x64xf32>
    %cst_22 = arith.constant 1.000000e+00 : f32
    %106 = vector.broadcast %cst_22 : f32 to vector<2x64xf32>
    %107 = arith.subf %106, %100 : vector<2x64xf32>
    %108 = arith.mulf %107, %105 : vector<2x64xf32>
    %109 = arith.mulf %100, %87 : vector<2x64xf32>
    %110 = arith.addf %108, %109 : vector<2x64xf32>
    %111 = arith.maximumf %88, %110 : vector<2x64xf32>
    %cst_23 = arith.constant dense<0.000000e+00> : vector<2x192xf32>
    %112 = tpu.matmul %110, %14, %cst_23 {dimension_numbers = #tpu.dot_dimension_numbers<[1], [0], [0], [1], [0, 0, 1, 1], [], []>} : vector<2x64xf32>, vector<64x192xf32>, vector<2x192xf32> -> vector<2x192xf32>
    %113 = arith.addf %112, %17 : vector<2x192xf32>
    %114 = vector.extract_strided_slice %10 {offsets = [0, 0], sizes = [2, 128], strides = [1, 1]} : vector<2x192xf32> to vector<2x128xf32>
    %115 = vector.extract_strided_slice %113 {offsets = [0, 0], sizes = [2, 128], strides = [1, 1]} : vector<2x192xf32> to vector<2x128xf32>
    %116 = arith.addf %114, %115 : vector<2x128xf32>
    %117 = arith.negf %116 : vector<2x128xf32>
    %118 = math.exp %117 : vector<2x128xf32>
    %cst_24 = arith.constant 1.000000e+00 : f32
    %119 = vector.broadcast %cst_24 : f32 to vector<2x128xf32>
    %120 = arith.addf %119, %118 : vector<2x128xf32>
    %121 = arith.divf %119, %120 : vector<2x128xf32>
    %122 = vector.extract_strided_slice %121 {offsets = [0, 0], sizes = [2, 64], strides = [1, 1]} : vector<2x128xf32> to vector<2x64xf32>
    %123 = vector.extract_strided_slice %121 {offsets = [0, 64], sizes = [2, 64], strides = [1, 1]} : vector<2x128xf32> to vector<2x64xf32>
    %124 = vector.extract_strided_slice %10 {offsets = [0, 128], sizes = [2, 64], strides = [1, 1]} : vector<2x192xf32> to vector<2x64xf32>
    %125 = vector.extract_strided_slice %113 {offsets = [0, 128], sizes = [2, 64], strides = [1, 1]} : vector<2x192xf32> to vector<2x64xf32>
    %126 = arith.mulf %122, %125 : vector<2x64xf32>
    %127 = arith.addf %124, %126 : vector<2x64xf32>
    %128 = math.tanh %127 : vector<2x64xf32>
    %cst_25 = arith.constant 1.000000e+00 : f32
    %129 = vector.broadcast %cst_25 : f32 to vector<2x64xf32>
    %130 = arith.subf %129, %123 : vector<2x64xf32>
    %131 = arith.mulf %130, %128 : vector<2x64xf32>
    %132 = arith.mulf %123, %110 : vector<2x64xf32>
    %133 = arith.addf %131, %132 : vector<2x64xf32>
    %134 = arith.maximumf %111, %133 : vector<2x64xf32>
    %cst_26 = arith.constant dense<0.000000e+00> : vector<2x192xf32>
    %135 = tpu.matmul %133, %14, %cst_26 {dimension_numbers = #tpu.dot_dimension_numbers<[1], [0], [0], [1], [0, 0, 1, 1], [], []>} : vector<2x64xf32>, vector<64x192xf32>, vector<2x192xf32> -> vector<2x192xf32>
    %136 = arith.addf %135, %17 : vector<2x192xf32>
    %137 = vector.extract_strided_slice %11 {offsets = [0, 0], sizes = [2, 128], strides = [1, 1]} : vector<2x192xf32> to vector<2x128xf32>
    %138 = vector.extract_strided_slice %136 {offsets = [0, 0], sizes = [2, 128], strides = [1, 1]} : vector<2x192xf32> to vector<2x128xf32>
    %139 = arith.addf %137, %138 : vector<2x128xf32>
    %140 = arith.negf %139 : vector<2x128xf32>
    %141 = math.exp %140 : vector<2x128xf32>
    %cst_27 = arith.constant 1.000000e+00 : f32
    %142 = vector.broadcast %cst_27 : f32 to vector<2x128xf32>
    %143 = arith.addf %142, %141 : vector<2x128xf32>
    %144 = arith.divf %142, %143 : vector<2x128xf32>
    %145 = vector.extract_strided_slice %144 {offsets = [0, 0], sizes = [2, 64], strides = [1, 1]} : vector<2x128xf32> to vector<2x64xf32>
    %146 = vector.extract_strided_slice %144 {offsets = [0, 64], sizes = [2, 64], strides = [1, 1]} : vector<2x128xf32> to vector<2x64xf32>
    %147 = vector.extract_strided_slice %11 {offsets = [0, 128], sizes = [2, 64], strides = [1, 1]} : vector<2x192xf32> to vector<2x64xf32>
    %148 = vector.extract_strided_slice %136 {offsets = [0, 128], sizes = [2, 64], strides = [1, 1]} : vector<2x192xf32> to vector<2x64xf32>
    %149 = arith.mulf %145, %148 : vector<2x64xf32>
    %150 = arith.addf %147, %149 : vector<2x64xf32>
    %151 = math.tanh %150 : vector<2x64xf32>
    %cst_28 = arith.constant 1.000000e+00 : f32
    %152 = vector.broadcast %cst_28 : f32 to vector<2x64xf32>
    %153 = arith.subf %152, %146 : vector<2x64xf32>
    %154 = arith.mulf %153, %151 : vector<2x64xf32>
    %155 = arith.mulf %146, %133 : vector<2x64xf32>
    %156 = arith.addf %154, %155 : vector<2x64xf32>
    %157 = arith.maximumf %134, %156 : vector<2x64xf32>
    %cst_29 = arith.constant dense<0.000000e+00> : vector<2x192xf32>
    %158 = tpu.matmul %156, %14, %cst_29 {dimension_numbers = #tpu.dot_dimension_numbers<[1], [0], [0], [1], [0, 0, 1, 1], [], []>} : vector<2x64xf32>, vector<64x192xf32>, vector<2x192xf32> -> vector<2x192xf32>
    %159 = arith.addf %158, %17 : vector<2x192xf32>
    %160 = vector.extract_strided_slice %12 {offsets = [0, 0], sizes = [2, 128], strides = [1, 1]} : vector<2x192xf32> to vector<2x128xf32>
    %161 = vector.extract_strided_slice %159 {offsets = [0, 0], sizes = [2, 128], strides = [1, 1]} : vector<2x192xf32> to vector<2x128xf32>
    %162 = arith.addf %160, %161 : vector<2x128xf32>
    %163 = arith.negf %162 : vector<2x128xf32>
    %164 = math.exp %163 : vector<2x128xf32>
    %cst_30 = arith.constant 1.000000e+00 : f32
    %165 = vector.broadcast %cst_30 : f32 to vector<2x128xf32>
    %166 = arith.addf %165, %164 : vector<2x128xf32>
    %167 = arith.divf %165, %166 : vector<2x128xf32>
    %168 = vector.extract_strided_slice %167 {offsets = [0, 0], sizes = [2, 64], strides = [1, 1]} : vector<2x128xf32> to vector<2x64xf32>
    %169 = vector.extract_strided_slice %167 {offsets = [0, 64], sizes = [2, 64], strides = [1, 1]} : vector<2x128xf32> to vector<2x64xf32>
    %170 = vector.extract_strided_slice %12 {offsets = [0, 128], sizes = [2, 64], strides = [1, 1]} : vector<2x192xf32> to vector<2x64xf32>
    %171 = vector.extract_strided_slice %159 {offsets = [0, 128], sizes = [2, 64], strides = [1, 1]} : vector<2x192xf32> to vector<2x64xf32>
    %172 = arith.mulf %168, %171 : vector<2x64xf32>
    %173 = arith.addf %170, %172 : vector<2x64xf32>
    %174 = math.tanh %173 : vector<2x64xf32>
    %cst_31 = arith.constant 1.000000e+00 : f32
    %175 = vector.broadcast %cst_31 : f32 to vector<2x64xf32>
    %176 = arith.subf %175, %169 : vector<2x64xf32>
    %177 = arith.mulf %176, %174 : vector<2x64xf32>
    %178 = arith.mulf %169, %156 : vector<2x64xf32>
    %179 = arith.addf %177, %178 : vector<2x64xf32>
    %180 = arith.maximumf %157, %179 : vector<2x64xf32>
    %cst_32 = arith.constant dense<0.000000e+00> : vector<2x192xf32>
    %181 = tpu.matmul %179, %14, %cst_32 {dimension_numbers = #tpu.dot_dimension_numbers<[1], [0], [0], [1], [0, 0, 1, 1], [], []>} : vector<2x64xf32>, vector<64x192xf32>, vector<2x192xf32> -> vector<2x192xf32>
    %182 = arith.addf %181, %17 : vector<2x192xf32>
    %183 = vector.extract_strided_slice %13 {offsets = [0, 0], sizes = [2, 128], strides = [1, 1]} : vector<2x192xf32> to vector<2x128xf32>
    %184 = vector.extract_strided_slice %182 {offsets = [0, 0], sizes = [2, 128], strides = [1, 1]} : vector<2x192xf32> to vector<2x128xf32>
    %185 = arith.addf %183, %184 : vector<2x128xf32>
    %186 = arith.negf %185 : vector<2x128xf32>
    %187 = math.exp %186 : vector<2x128xf32>
    %cst_33 = arith.constant 1.000000e+00 : f32
    %188 = vector.broadcast %cst_33 : f32 to vector<2x128xf32>
    %189 = arith.addf %188, %187 : vector<2x128xf32>
    %190 = arith.divf %188, %189 : vector<2x128xf32>
    %191 = vector.extract_strided_slice %190 {offsets = [0, 0], sizes = [2, 64], strides = [1, 1]} : vector<2x128xf32> to vector<2x64xf32>
    %192 = vector.extract_strided_slice %190 {offsets = [0, 64], sizes = [2, 64], strides = [1, 1]} : vector<2x128xf32> to vector<2x64xf32>
    %193 = vector.extract_strided_slice %13 {offsets = [0, 128], sizes = [2, 64], strides = [1, 1]} : vector<2x192xf32> to vector<2x64xf32>
    %194 = vector.extract_strided_slice %182 {offsets = [0, 128], sizes = [2, 64], strides = [1, 1]} : vector<2x192xf32> to vector<2x64xf32>
    %195 = arith.mulf %191, %194 : vector<2x64xf32>
    %196 = arith.addf %193, %195 : vector<2x64xf32>
    %197 = math.tanh %196 : vector<2x64xf32>
    %cst_34 = arith.constant 1.000000e+00 : f32
    %198 = vector.broadcast %cst_34 : f32 to vector<2x64xf32>
    %199 = arith.subf %198, %192 : vector<2x64xf32>
    %200 = arith.mulf %199, %197 : vector<2x64xf32>
    %201 = arith.mulf %192, %179 : vector<2x64xf32>
    %202 = arith.addf %200, %201 : vector<2x64xf32>
    %203 = arith.maximumf %180, %202 : vector<2x64xf32>
    %c0_35 = arith.constant 0 : index
    %c0_36 = arith.constant 0 : index
    %204 = vector.load %arg5[%c0_35, %c0_36] : memref<64x4xf32, #tpu.memory_space<vmem>>, vector<64x4xf32>
    %cst_37 = arith.constant dense<0.000000e+00> : vector<2x4xf32>
    %205 = tpu.matmul %203, %204, %cst_37 {dimension_numbers = #tpu.dot_dimension_numbers<[1], [0], [0], [1], [0, 0, 1, 1], [], []>} : vector<2x64xf32>, vector<64x4xf32>, vector<2x4xf32> -> vector<2x4xf32>
    %c0_38 = arith.constant 0 : index
    %c0_39 = arith.constant 0 : index
    %206 = vector.load %arg6[%c0_38, %c0_39] : memref<1x4xf32, #tpu.memory_space<vmem>>, vector<1x4xf32>
    %207 = vector.broadcast %206 : vector<1x4xf32> to vector<2x4xf32>
    %208 = arith.addf %205, %207 : vector<2x4xf32>
    %c0_40 = arith.constant 0 : index
    %c0_41 = arith.constant 0 : index
    %209 = vector.load %arg7[%c0_40, %c0_41] : memref<2x4xf32, #tpu.memory_space<vmem>>, vector<2x4xf32>
    tpu.vector_store %arg7[%c0_40, %c0_41], %208 {strides = array<i32>} : memref<2x4xf32, #tpu.memory_space<vmem>>, vector<2x4xf32>,
    return
  }
}

</mosaic_0001>

<bundles_post_ra>
// kernel: tpu_custom_call.1
= control target key start
LH: loop header
LB: loop body
LE: loop exit
PB: predicated region body
PF: predicated region fallthrough
CT: control target
= control target key end

     0   :  { %12 = vsyncpa [#allocation3], 0  ;;  %s1759_s0 = inlined_call_operand.vmem [shape: f32[16,64], index: 0, kind: input, shape index: {}]   ;;  %s1760_s1 = inlined_call_operand.hbm [shape: f32[64,192], index: 1, kind: input, shape index: {}]   ;;  %s1761_s2 = inlined_call_operand.vmem [shape: f32[1,192], index: 2, kind: input, shape index: {}]   ;;  %s1762_s3 = inlined_call_operand.hbm [shape: f32[64,192], index: 3, kind: input, shape index: {}]   ;;  %s1763_s4 = inlined_call_operand.vmem [shape: f32[1,192], index: 4, kind: input, shape index: {}]   ;;  %s1764_s5 = inlined_call_operand.vmem [shape: f32[64,4], index: 5, kind: input, shape index: {}]   ;;  %s1765_s6 = inlined_call_operand.vmem [shape: f32[1,4], index: 6, kind: input, shape index: {}]   ;;  %s1766_s7 = inlined_call_operand.hbm [shape: f32[2,4], index: 7, kind: output, shape index: {}]  }
   0x1   :  { %13 = vsyncpa [#allocation6], 0 }
   0x2   :  { %14 = vsyncpa [#allocation4], 0  ;;  %s1456_s24 = smov [#allocation2]   ;;  %s1384_s28 = scalar_lea.hbm %s1760_s1, 2048 }
   0x3   :  { %s22_s25 = sshll.u32 %s1456_s24, 4  ;;  %p1385_p0 = scmp.ne.s32.totalorder %s1760_s1, %s1384_s28  ;;  %s23_s25 = int_to_ptr.vmem [resolvable:$true] %s22_s25 }
   0x4   :  { %p1388_p1 = scmp.lt.u32.totalorder %s1384_s28, %s1760_s1 }
   0x6   :  { %p1390_p2 = pnand %p1388_p1, %p1385_p0 }
   0x8   :  { %1393 = shalt.err (!%p1390_p2)
}
   0x9   :  { %s1394_s10 = scalar_lea.vmem %s23_s25, 2048  ;;  %p1399_p4 = scmp.lt.s32.totalorder %s23_s25, %s23_s25 }
   0xa   :  { %p1395_p3 = scmp.ne.s32.totalorder %s23_s25, %s1394_s10  ;;  %p1400_p5 = scmp.lt.s32.totalorder %s1394_s10, %s1394_s10 }
   0xc   :  { %p1401_p6 = por %p1400_p5, %p1399_p4 }
   0xe   :  { %p1402_p7 = pnand %p1401_p6, %p1395_p3 }
  0x10   :  { %1405 = shalt.err (!%p1402_p7)
}
  0x11   :  { %s1457_s11 = smov 256   ;;  %s1458_s12 = smov 16  }
  0x12   :  { %28 = dma.hbm_to_vmem [thread:$0]  %s1760_s1, 2048, %s23_s25, [#allocation3], %s1457_s11, %s1457_s11, %s1458_s12  }
  0x13   :  { %s1459_s15 = smov [#allocation5]   ;;  %s1406_s19 = scalar_lea.hbm %s1762_s3, 2048 }
  0x14   :  { %s36_s16 = sshll.u32 %s1459_s15, 4  ;;  %p1407_p8 = scmp.ne.s32.totalorder %s1762_s3, %s1406_s19  ;;  %s37_s16 = int_to_ptr.vmem [resolvable:$true] %s36_s16 }
  0x15   :  { %p1410_p9 = scmp.lt.u32.totalorder %s1406_s19, %s1762_s3 }
  0x17   :  { %p1412_p10 = pnand %p1410_p9, %p1407_p8 }
  0x19   :  { %1415 = shalt.err (!%p1412_p10)
}
  0x1a   :  { %s1416_s24 = scalar_lea.vmem %s37_s16, 2048  ;;  %p1421_p12 = scmp.lt.s32.totalorder %s37_s16, %s37_s16 }
  0x1b   :  { %p1417_p11 = scmp.ne.s32.totalorder %s37_s16, %s1416_s24  ;;  %p1422_p13 = scmp.lt.s32.totalorder %s1416_s24, %s1416_s24 }
  0x1d   :  { %p1423_p0 = por %p1422_p13, %p1421_p12 }
  0x1f   :  { %p1424_p1 = pnand %p1423_p0, %p1417_p11 }
  0x21   :  { %1427 = shalt.err (!%p1424_p1)
}
  0x22   :  { %42 = dma.hbm_to_vmem [thread:$0]  %s1762_s3, 2048, %s37_s16, [#allocation6], %s1457_s11, %s1457_s11, %s1458_s12  }
  0x23   :  { %1450 = dma.done.wait [#allocation3], 2048  }
  0x24   :  { %1451 = vsyncadd [#allocation3], 4294965248 }
  0x25   :  { %1452 = dma.done.wait [#allocation6], 2048  }
  0x26   :  { %1453 = vsyncadd [#allocation6], 4294965248  ;;  %v1460_v0 = vmov 0.0   ;;  %v58_v1 = vld [vmem:[#allocation2 + $0x8] sm:$0xff]  ;;  %v60_v2 = vld [vmem:[#allocation2 + $0x18] sm:$0xff]  ;;  %vm85_vm0 = vcmask 523264   ;;  %v75_v50 = vlaneseq }
  0x27   :  { %156 = vmatprep.mubr.f32.mxu0 %v1460_v0  ;;  %264 = vmatprep.mubr.f32.mxu1 %v1460_v0  ;;  %v170_v3 = vld [vmem:[#allocation5 + $0x8] sm:$0xff]  ;;  %v1171_v4 = vpack.c.bf16 %v60_v2, %v58_v1  ;;  %v172_v5 = vld [vmem:[#allocation5 + $0x18] sm:$0xff]  ;;  %v57_v6 = vld [vmem:[#allocation2] sm:$0xff]  ;;  %s1461_s8 = smov 64   ;;  %vm1463_vm1 = vmmov 0   ;;  %vm1106_vm2 = vcmask 25600  }
  0x28   :  { %v59_v7 = vld [vmem:[#allocation2 + $0x10] sm:$0xff]  ;;  %v1531_v8 = vpack.c.bf16 %v172_v5, %v170_v3  ;;  %v169_v10 = vld [vmem:[#allocation5] sm:$0xff]  ;;  %v62_v12 = vld [vmem:[#allocation2 + $0x28] sm:$0xff]  ;;  %v76_v51 = vshrl.u32 %v75_v50, 7 }
  0x29   :  { %v1173_v9 = vpack.c.bf16 %v59_v7, %v57_v6  ;;  %v171_v11 = vld [vmem:[#allocation5 + $0x10] sm:$0xff]  ;;  %1172 = vmatprep.subr.bf16.mxu0 %v1171_v4  ;;  %v64_v14 = vld [vmem:[#allocation2 + $0x38] sm:$0xff]  ;;  %v174_v15 = vld [vmem:[#allocation5 + $0x28] sm:$0xff] }
  0x2a   :  { %v1533_v13 = vpack.c.bf16 %v171_v11, %v169_v10  ;;  %v176_v16 = vld [vmem:[#allocation5 + $0x38] sm:$0xff]  ;;  %1188 = vmatprep.subr.bf16.mxu1 %v1531_v8  ;;  %v1175_v17 = vpack.c.bf16 %v64_v14, %v62_v12  ;;  %v61_v19 = vld [vmem:[#allocation2 + $0x20] sm:$0xff]  ;;  %v63_v20 = vld [vmem:[#allocation2 + $0x30] sm:$0xff]  ;;  %v77_v52 = vsub.s32 0, %v76_v51  ;;  %v81_v4 = vsub.s32 1, %v76_v51 }
  0x2b   :  { %1174 = vmatpush1.bf16.msra.mxu0 %v1173_v9  ;;  %v1536_v18 = vpack.c.bf16 %v176_v16, %v174_v15  ;;  %v173_v21 = vld [vmem:[#allocation5 + $0x20] sm:$0xff]  ;;  %v1177_v22 = vpack.c.bf16 %v63_v20, %v61_v19  ;;  %v175_v23 = vld [vmem:[#allocation5 + $0x30] sm:$0xff]  ;;  %v66_v24 = vld [vmem:[#allocation2 + $0x48] sm:$0xff] }
  0x2c   :  { %1190 = vmatpush1.bf16.msra.mxu1 %v1533_v13  ;;  %v68_v25 = vld [vmem:[#allocation2 + $0x58] sm:$0xff]  ;;  %1176 = vmatprep.subr.bf16.mxu0 %v1175_v17  ;;  %v1540_v26 = vpack.c.bf16 %v175_v23, %v173_v21  ;;  %v178_v28 = vld [vmem:[#allocation5 + $0x48] sm:$0xff]  ;;  %v65_v30 = vld [vmem:[#allocation2 + $0x40] sm:$0xff] }
  0x2d   :  { %1192 = vmatprep.subr.bf16.mxu1 %v1536_v18  ;;  %v1179_v27 = vpack.c.bf16 %v68_v25, %v66_v24  ;;  %v180_v29 = vld [vmem:[#allocation5 + $0x58] sm:$0xff]  ;;  %v67_v32 = vld [vmem:[#allocation2 + $0x50] sm:$0xff]  ;;  %v177_v33 = vld [vmem:[#allocation5 + $0x40] sm:$0xff] }
  0x2e   :  { %v1542_v31 = vpack.c.bf16 %v180_v29, %v178_v28  ;;  %v179_v34 = vld [vmem:[#allocation5 + $0x50] sm:$0xff]  ;;  %v1181_v35 = vpack.c.bf16 %v67_v32, %v65_v30  ;;  %v70_v36 = vld [vmem:[#allocation2 + $0x68] sm:$0xff]  ;;  %v72_v37 = vld [vmem:[#allocation2 + $0x78] sm:$0xff] }
  0x2f   :  { %1178 = vmatpush1.bf16.msra.mxu0 %v1177_v22  ;;  %v182_v38 = vld [vmem:[#allocation5 + $0x68] sm:$0xff]  ;;  %v1545_v39 = vpack.c.bf16 %v179_v34, %v177_v33  ;;  %v1183_v40 = vpack.c.bf16 %v72_v37, %v70_v36  ;;  %v184_v41 = vld [vmem:[#allocation5 + $0x78] sm:$0xff]  ;;  %v69_v42 = vld [vmem:[#allocation2 + $0x60] sm:$0xff] }
  0x30   :  { %1194 = vmatpush1.bf16.msra.mxu1 %v1540_v26  ;;  %1180 = vmatprep.subr.bf16.mxu0 %v1179_v27  ;;  %v71_v43 = vld [vmem:[#allocation2 + $0x70] sm:$0xff]  ;;  %v1548_v44 = vpack.c.bf16 %v184_v41, %v182_v38  ;;  %v181_v45 = vld [vmem:[#allocation5 + $0x60] sm:$0xff]  ;;  %v56_v14 = vld [vmem:[%s1759_s0 + $0x8] sm:$0xff] }
  0x31   :  { %1196 = vmatprep.subr.bf16.mxu1 %v1542_v31  ;;  %v183_v46 = vld [vmem:[#allocation5 + $0x70] sm:$0xff]  ;;  %v1185_v47 = vpack.c.bf16 %v71_v43, %v69_v42  ;;  %v55_v49 = vld [vmem:[%s1759_s0] sm:$0xff] }
  0x32   :  { %v1551_v48 = vpack.c.bf16 %v183_v46, %v181_v45  ;;  %v73_v53 = vld [vmem:[%s1761_s2] sm:$0x3] }
  0x33   :  { %1182 = vmatpush1.bf16.msra.mxu0 %v1181_v35  ;;  %v185_v54 = vld [vmem:[%s1763_s4] sm:$0x3]  ;;  %v1586_v55 = vrot.slane %v73_v53, %v77_v52  ;;  %v1597_v6 = vrot.slane %v73_v53, %v81_v4 }
  0x34   :  { %1198 = vmatpush1.bf16.msra.mxu1 %v1545_v39  ;;  %1184 = vmatprep.subr.bf16.mxu0 %v1183_v40  ;;  %v1588_v56 = vrot.slane %v185_v54, %v77_v52  ;;  %v1595_v5 = vrot.slane %v185_v54, %v81_v4 }
  0x35   :  { %1200 = vmatprep.subr.bf16.mxu1 %v1548_v44 }
  0x37   :  { %1186 = vmatpush1.bf16.msra.mxu0 %v1185_v47 }
  0x38   :  { %1202 = vmatpush1.bf16.msra.mxu1 %v1551_v48  ;;  %1204 = vmatprep.subr.bf16.mxu0 %v1531_v8 }
  0x39   :  { %1220 = vmatprep.subr.bf16.mxu1 %v1531_v8 }
  0x3a   :  { %1124 = vmatmul.mubr.msk.f32.vlgmr.msra.gmra.mrb[0].mxu0 %vm85_vm0, %v55_v49 }
  0x3b   :  { %265 = vmatmul.mubr.f32.vlgmr.msra.gmra.mrb[0].mxu1 %v1460_v0  ;;  %1206 = vmatpush1.bf16.msra.mxu0 %v1533_v13 }
  0x3c   :  { %1208 = vmatprep.subr.bf16.mxu0 %v1536_v18  ;;  %162 = vmatprep.mubr.f32.mxu0 %v1460_v0 }
  0x3d   :  { %1222 = vmatpush1.bf16.msra.mxu1 %v1533_v13  ;;  %464 = vmatprep.mubr.f32.mxu1 %v1460_v0 }
  0x3e   :  { %1224 = vmatprep.subr.bf16.mxu1 %v1536_v18  ;;  %1125 = vmatmul.mubr.msk.f32.gmra.mrb[2].mxu0 %vm85_vm0, %v56_v14 }
  0x3f   :  { %1210 = vmatpush1.bf16.msra.mxu0 %v1540_v26  ;;  %359 = vmatprep.mubr.f32.mxu0 %v1460_v0 }
  0x40   :  { %1212 = vmatprep.subr.bf16.mxu0 %v1542_v31 }
  0x41   :  { %1226 = vmatpush1.bf16.msra.mxu1 %v1540_v26 }
  0x42   :  { %1228 = vmatprep.subr.bf16.mxu1 %v1542_v31 }
  0x43   :  { %1214 = vmatpush1.bf16.msra.mxu0 %v1545_v39 }
  0x44   :  { %1216 = vmatprep.subr.bf16.mxu0 %v1548_v44 }
  0x45   :  { %1230 = vmatpush1.bf16.msra.mxu1 %v1545_v39 }
  0x46   :  { %1232 = vmatprep.subr.bf16.mxu1 %v1548_v44 }
  0x47   :  { %1218 = vmatpush1.bf16.msra.mxu0 %v1551_v48 }
  0x48   :  { %1236 = vmatprep.subr.bf16.mxu0 %v1531_v8 }
  0x49   :  { %1234 = vmatpush1.bf16.msra.mxu1 %v1551_v48 }
  0x4a   :  { %1252 = vmatprep.subr.bf16.mxu1 %v1531_v8 }
 0x10d   :  { %v158_v57 = vpop.f32.mrb[0].mxu0 }
 0x10e   :  { %v1591_v58 = vadd.f32 %v158_v57, %v1586_v55  ;;  %v266_v59 = vpop.f32.mrb[0].mxu1  ;;  %v160_v60 = vpop.f32.mrb[1].mxu0 }
 0x10f   :  { %v267_v61 = vadd.f32 %v266_v59, %v1588_v56  ;;  %v268_v62 = vpop.f32.mrb[1].mxu1  ;;  %v1601_v10 = vadd.f32 %v160_v60, %v1597_v6 }
 0x110   :  { %v269_v7 = vadd.f32 %v268_v62, %v1595_v5 }
 0x111   :  { %v271_v63 = vadd.f32 %v267_v61, %v1591_v58  ;;  %v1611_v22 = vpop.f32.mrb[2].mxu0 }
 0x112   :  { %v1613_v23 = vpop.f32.mrb[3].mxu0 }
 0x113   :  { %v1126_v1 = vmul.f32 -1.442695, %v271_v63 }
 0x115   :  { %1336 = vpow2.f32 %v1126_v1 }
 0x11f   :  { %v1337_v2 = vpop.eup %1336 }
 0x120   :  { %v275_v3 = vadd.f32 1.0, %v1337_v2 }
 0x122   :  { %1338 = vrcp.f32 %v275_v3 }
 0x12c   :  { %v1339_v9 = vpop.eup %1338 }
 0x12d   :  { %v278_v11 = vmul.f32 %v1339_v9, %v269_v7  ;;  %v281_v16 = vsub.f32 1.0, %v1339_v9  ;;  %v287_v19 = vmul.f32 0.0, %v1339_v9 }
 0x12f   :  { %v279_v12 = vadd.f32 %v278_v11, %v1601_v10 }
 0x131   :  { %1340 = vtanh.f32 %v279_v12 }
 0x13b   :  { %v1341_v15 = vpop.eup %1340 }
 0x13c   :  { %283 = vrot.lane.b32.xlu0 %v1341_v15, %s1461_s8 }
 0x1ae   :  { %v284_v17 = vpop.permute.xlu0 %283 }
 0x1af   :  { %v286_v20 = vmul.f32 %v284_v17, %v281_v16 }
 0x1b1   :  { %v288_v21 = vadd.f32 %v287_v19, %v286_v20 }
 0x1b3   :  { %291 = vrot.lane.b32.xlu0 %v288_v21, %s1461_s8  ;;  %v388_v37 = vrot.slane %v288_v21, 6  ;;  %v289_v50 = vmax.f32 %v288_v21, 0.0 }
 0x225   :  { %v292_v24 = vpop.permute.xlu0 %291 }
 0x226   :  { %1127 = vmatmul.mubr.msk.f32.vlgmr.msra.gmra.mrb[4].mxu0 %vm85_vm0, %v292_v24 }
 0x227   :  { %1238 = vmatpush1.bf16.msra.mxu0 %v1533_v13  ;;  %569 = vmatprep.mubr.f32.mxu0 %v1460_v0 }
 0x228   :  { %1240 = vmatprep.subr.bf16.mxu0 %v1536_v18 }
 0x22b   :  { %1242 = vmatpush1.bf16.msra.mxu0 %v1540_v26 }
 0x22c   :  { %1244 = vmatprep.subr.bf16.mxu0 %v1542_v31 }
 0x22f   :  { %1246 = vmatpush1.bf16.msra.mxu0 %v1545_v39 }
 0x230   :  { %1248 = vmatprep.subr.bf16.mxu0 %v1548_v44 }
 0x233   :  { %1250 = vmatpush1.bf16.msra.mxu0 %v1551_v48 }
 0x234   :  { %1268 = vmatprep.subr.bf16.mxu0 %v1531_v8 }
 0x2f9   :  { %v361_v25 = vpop.f32.mrb[4].mxu0 }
 0x2fa   :  { %v362_v27 = vadd.f32 %v361_v25, %v1588_v56  ;;  %v363_v28 = vpop.f32.mrb[5].mxu0 }
 0x2fb   :  { %v364_v35 = vadd.f32 %v363_v28, %v1595_v5 }
 0x2fc   :  { %v367_v29 = vrot.slane %v362_v27, 6 }
 0x2fd   :  { %v377_v36 = vrot.slane %v364_v35, 6 }
 0x2fe   :  { %v369_v30 = vadd.f32 %v367_v29, %v1591_v58 }
 0x300   :  { %v1128_v32 = vmul.f32 -1.442695, %v369_v30 }
 0x302   :  { %1342 = vpow2.f32 %v1128_v32 }
 0x30c   :  { %v1343_v33 = vpop.eup %1342 }
 0x30d   :  { %v373_v34 = vadd.f32 1.0, %v1343_v33 }
 0x30f   :  { %1344 = vrcp.f32 %v373_v34 }
 0x319   :  { %v1345_v38 = vpop.eup %1344 }
 0x31a   :  { %v379_v40 = vmul.f32 %v1345_v38, %v377_v36  ;;  %v390_v41 = vmul.f32 %v1345_v38, %v388_v37  ;;  %v382_v45 = vsub.f32 1.0, %v1345_v38 }
 0x31c   :  { %v380_v42 = vadd.f32 %v379_v40, %v1601_v10 }
 0x31e   :  { %1346 = vtanh.f32 %v380_v42 }
 0x328   :  { %v1347_v43 = vpop.eup %1346 }
 0x329   :  { %384 = vrot.lane.b32.xlu1 %v1347_v43, %s1461_s8 }
 0x39b   :  { %v385_v46 = vpop.permute.xlu1 %384 }
 0x39c   :  { %v387_v47 = vmul.f32 %v385_v46, %v382_v45 }
 0x39e   :  { %v391_v49 = vadd.f32 %v390_v41, %v387_v47 }
 0x3a0   :  { %v393_v51 = vrot.slane %v391_v49, 2  ;;  %v493_v3 = vrot.slane %v391_v49, 6 }
 0x3a2   :  { %396 = vrot.lane.b32.xlu1 %v393_v51, %s1461_s8  ;;  %v395_v52 = vmax.f32 %v289_v50, %v393_v51  ;;  %v1676_v50 = vadd.f32 %v1611_v22, %v1586_v55 }
 0x414   :  { %v397_v53 = vpop.permute.xlu1 %396 }
 0x415   :  { %1129 = vmatmul.mubr.msk.f32.vlgmr.msra.gmra.mrb[2].mxu1 %vm85_vm0, %v397_v53 }
 0x416   :  { %1254 = vmatpush1.bf16.msra.mxu1 %v1533_v13  ;;  %674 = vmatprep.mubr.f32.mxu1 %v1460_v0 }
 0x417   :  { %1256 = vmatprep.subr.bf16.mxu1 %v1536_v18 }
 0x41a   :  { %1258 = vmatpush1.bf16.msra.mxu1 %v1540_v26 }
 0x41b   :  { %1260 = vmatprep.subr.bf16.mxu1 %v1542_v31 }
 0x41e   :  { %1262 = vmatpush1.bf16.msra.mxu1 %v1545_v39 }
 0x41f   :  { %1264 = vmatprep.subr.bf16.mxu1 %v1548_v44 }
 0x422   :  { %1266 = vmatpush1.bf16.msra.mxu1 %v1551_v48 }
 0x423   :  { %1284 = vmatprep.subr.bf16.mxu1 %v1531_v8 }
 0x4e8   :  { %v466_v54 = vpop.f32.mrb[2].mxu1 }
 0x4e9   :  { %v467_v57 = vadd.f32 %v466_v54, %v1588_v56  ;;  %v468_v59 = vpop.f32.mrb[3].mxu1 }
 0x4ea   :  { %v469_v2 = vadd.f32 %v468_v59, %v1595_v5 }
 0x4eb   :  { %v472_v60 = vrot.slane %v467_v57, 4 }
 0x4ec   :  { %v482_v4 = vrot.slane %v469_v2, 4 }
 0x4ed   :  { %v474_v61 = vadd.f32 %v472_v60, %v1591_v58 }
 0x4ef   :  { %v1130_v62 = vmul.f32 -1.442695, %v474_v61 }
 0x4f1   :  { %1348 = vpow2.f32 %v1130_v62  ;;  %v1683_v62 = vadd.f32 %v1613_v23, %v1597_v6 }
 0x4fb   :  { %v1349_v63 = vpop.eup %1348 }
 0x4fc   :  { %v478_v1 = vadd.f32 1.0, %v1349_v63 }
 0x4fe   :  { %1350 = vrcp.f32 %v478_v1 }
 0x508   :  { %v1351_v7 = vpop.eup %1350 }
 0x509   :  { %v484_v9 = vmul.f32 %v1351_v7, %v482_v4  ;;  %v495_v11 = vmul.f32 %v1351_v7, %v493_v3  ;;  %v487_v15 = vsub.f32 1.0, %v1351_v7 }
 0x50b   :  { %v485_v12 = vadd.f32 %v484_v9, %v1601_v10 }
 0x50d   :  { %1352 = vtanh.f32 %v485_v12 }
 0x517   :  { %v1353_v14 = vpop.eup %1352 }
 0x518   :  { %489 = vrot.lane.b32.xlu0 %v1353_v14, %s1461_s8 }
 0x58a   :  { %v490_v16 = vpop.permute.xlu0 %489 }
 0x58b   :  { %v492_v17 = vmul.f32 %v490_v16, %v487_v15 }
 0x58d   :  { %v496_v19 = vadd.f32 %v495_v11, %v492_v17 }
 0x58f   :  { %v498_v20 = vrot.slane %v496_v19, 4  ;;  %v598_v36 = vrot.slane %v496_v19, 6 }
 0x591   :  { %501 = vrot.lane.b32.xlu1 %v498_v20, %s1461_s8  ;;  %v1647_v21 = vmax.f32 %v395_v52, %v498_v20 }
 0x603   :  { %v502_v24 = vpop.permute.xlu1 %501 }
 0x604   :  { %1131 = vmatmul.mubr.msk.f32.vlgmr.msra.gmra.mrb[6].mxu0 %vm85_vm0, %v502_v24 }
 0x605   :  { %1270 = vmatpush1.bf16.msra.mxu0 %v1533_v13  ;;  %769 = vmatprep.mubr.f32.mxu0 %v1460_v0 }
 0x606   :  { %1272 = vmatprep.subr.bf16.mxu0 %v1536_v18 }
 0x609   :  { %1274 = vmatpush1.bf16.msra.mxu0 %v1540_v26 }
 0x60a   :  { %1276 = vmatprep.subr.bf16.mxu0 %v1542_v31 }
 0x60d   :  { %1278 = vmatpush1.bf16.msra.mxu0 %v1545_v39 }
 0x60e   :  { %1280 = vmatprep.subr.bf16.mxu0 %v1548_v44 }
 0x611   :  { %1282 = vmatpush1.bf16.msra.mxu0 %v1551_v48 }
 0x612   :  { %1300 = vmatprep.subr.bf16.mxu0 %v1531_v8 }
 0x6d7   :  { %v571_v25 = vpop.f32.mrb[6].mxu0 }
 0x6d8   :  { %v572_v27 = vadd.f32 %v571_v25, %v1588_v56  ;;  %v573_v28 = vpop.f32.mrb[7].mxu0 }
 0x6d9   :  { %v574_v35 = vadd.f32 %v573_v28, %v1595_v5 }
 0x6da   :  { %v577_v29 = vrot.slane %v572_v27, 2 }
 0x6db   :  { %v587_v37 = vrot.slane %v574_v35, 2 }
 0x6dc   :  { %v579_v30 = vadd.f32 %v577_v29, %v1591_v58 }
 0x6de   :  { %v1132_v32 = vmul.f32 -1.442695, %v579_v30 }
 0x6e0   :  { %1354 = vpow2.f32 %v1132_v32 }
 0x6ea   :  { %v1355_v33 = vpop.eup %1354 }
 0x6eb   :  { %v583_v34 = vadd.f32 1.0, %v1355_v33 }
 0x6ed   :  { %1356 = vrcp.f32 %v583_v34 }
 0x6f7   :  { %v1357_v38 = vpop.eup %1356 }
 0x6f8   :  { %v589_v40 = vmul.f32 %v1357_v38, %v587_v37  ;;  %v600_v41 = vmul.f32 %v1357_v38, %v598_v36  ;;  %v592_v43 = vsub.f32 1.0, %v1357_v38 }
 0x6fa   :  { %v590_v8 = vadd.f32 %v589_v40, %v1601_v10 }
 0x6fc   :  { %1358 = vtanh.f32 %v590_v8 }
 0x706   :  { %v1359_v42 = vpop.eup %1358 }
 0x707   :  { %594 = vrot.lane.b32.xlu0 %v1359_v42, %s1461_s8 }
 0x779   :  { %v595_v58 = vpop.permute.xlu0 %594 }
 0x77a   :  { %v597_v45 = vmul.f32 %v595_v58, %v592_v43 }
 0x77c   :  { %v601_v46 = vadd.f32 %v600_v41, %v597_v45 }
 0x77e   :  { %v603_v47 = vrot.slane %v601_v46, 6 }
 0x780   :  { %606 = vrot.lane.b32.xlu1 %v603_v47, %s1461_s8  ;;  %v605_v7 = vmax.f32 %v1647_v21, %v603_v47 }
 0x7f2   :  { %v607_v49 = vpop.permute.xlu1 %606 }
 0x7f3   :  { %1133 = vmatmul.mubr.msk.f32.vlgmr.msra.gmra.mrb[4].mxu1 %vm85_vm0, %v607_v49 }
 0x7f4   :  { %1286 = vmatpush1.bf16.msra.mxu1 %v1533_v13  ;;  %874 = vmatprep.mubr.f32.mxu1 %v1460_v0 }
 0x7f5   :  { %1288 = vmatprep.subr.bf16.mxu1 %v1536_v18 }
 0x7f8   :  { %1290 = vmatpush1.bf16.msra.mxu1 %v1540_v26 }
 0x7f9   :  { %1292 = vmatprep.subr.bf16.mxu1 %v1542_v31 }
 0x7fc   :  { %1294 = vmatpush1.bf16.msra.mxu1 %v1545_v39 }
 0x7fd   :  { %1296 = vmatprep.subr.bf16.mxu1 %v1548_v44 }
 0x800   :  { %1298 = vmatpush1.bf16.msra.mxu1 %v1551_v48 }
 0x8c6   :  { %v676_v10 = vpop.f32.mrb[4].mxu1 }
 0x8c7   :  { %v677_v51 = vadd.f32 %v676_v10, %v1588_v56  ;;  %v678_v52 = vpop.f32.mrb[5].mxu1 }
 0x8c8   :  { %v679_v60 = vadd.f32 %v678_v52, %v1595_v5 }
 0x8c9   :  { %v681_v53 = vadd.f32 %v677_v51, %v1676_v50 }
 0x8cb   :  { %v1134_v54 = vmul.f32 -1.442695, %v681_v53 }
 0x8cd   :  { %1360 = vpow2.f32 %v1134_v54 }
 0x8d7   :  { %v1361_v57 = vpop.eup %1360 }
 0x8d8   :  { %v685_v59 = vadd.f32 1.0, %v1361_v57 }
 0x8da   :  { %1362 = vrcp.f32 %v685_v59 }
 0x8e4   :  { %v1363_v61 = vpop.eup %1362 }
 0x8e5   :  { %v688_v63 = vmul.f32 %v1363_v61, %v679_v60  ;;  %v691_v1 = vsub.f32 1.0, %v1363_v61  ;;  %v697_v3 = vmul.f32 %v1363_v61, %v603_v47 }
 0x8e7   :  { %v689_v55 = vadd.f32 %v688_v63, %v1683_v62 }
 0x8e9   :  { %1364 = vtanh.f32 %v689_v55 }
 0x8f3   :  { %v1365_v22 = vpop.eup %1364 }
 0x8f4   :  { %693 = vrot.lane.b32.xlu0 %v1365_v22, %s1461_s8 }
 0x966   :  { %v694_v2 = vpop.permute.xlu0 %693 }
 0x967   :  { %v696_v4 = vmul.f32 %v694_v2, %v691_v1 }
 0x969   :  { %v698_v9 = vadd.f32 %v697_v3, %v696_v4 }
 0x96b   :  { %v699_v11 = vmax.f32 %v605_v7, %v698_v9  ;;  %701 = vrot.lane.b32.xlu1 %v698_v9, %s1461_s8 }
 0x9dd   :  { %v702_v12 = vpop.permute.xlu1 %701 }
 0x9de   :  { %1135 = vmatmul.mubr.msk.f32.vlgmr.msra.gmra.mrb[8].mxu0 %vm85_vm0, %v702_v12 }
 0x9df   :  { %1302 = vmatpush1.bf16.msra.mxu0 %v1533_v13  ;;  %979 = vmatprep.mubr.f32.mxu0 %v1460_v0 }
 0x9e0   :  { %1304 = vmatprep.subr.bf16.mxu0 %v1536_v18 }
 0x9e3   :  { %1306 = vmatpush1.bf16.msra.mxu0 %v1540_v26 }
 0x9e4   :  { %1308 = vmatprep.subr.bf16.mxu0 %v1542_v31 }
 0x9e7   :  { %1310 = vmatpush1.bf16.msra.mxu0 %v1545_v39  ;;  %v798_v39 = vrot.slane %v698_v9, 6 }
 0x9e8   :  { %1312 = vmatprep.subr.bf16.mxu0 %v1548_v44 }
 0x9eb   :  { %1314 = vmatpush1.bf16.msra.mxu0 %v1551_v48 }
 0xab1   :  { %v771_v6 = vpop.f32.mrb[8].mxu0 }
 0xab2   :  { %v772_v23 = vadd.f32 %v771_v6, %v1588_v56  ;;  %v773_v14 = vpop.f32.mrb[9].mxu0 }
 0xab3   :  { %v774_v26 = vadd.f32 %v773_v14, %v1595_v5  ;;  %v1462_v14 = vmov 0.0|0.0  }
 0xab4   :  { %v777_v15 = vrot.slane %v772_v23, 6  ;;  %1315 = vmatprep.subr.bf16.mxu1 %v1462_v14 }
 0xab5   :  { %v787_v31 = vrot.slane %v774_v26, 6 }
 0xab6   :  { %v779_v13 = vadd.f32 %v777_v15, %v1676_v50 }
 0xab8   :  { %v1136_v16 = vmul.f32 -1.442695, %v779_v13 }
 0xaba   :  { %1366 = vpow2.f32 %v1136_v16 }
 0xac4   :  { %v1367_v18 = vpop.eup %1366 }
 0xac5   :  { %v783_v17 = vadd.f32 1.0, %v1367_v18  ;;  %v1020_v18 = vld [vmem:[%s1764_s5 + $0x20] sm:$0xff] }
 0xac7   :  { %1368 = vrcp.f32 %v783_v17  ;;  %v1021_v17 = vld [vmem:[%s1764_s5 + $0x28] sm:$0xff] }
 0xac8   :  { %v1322_v26 = vpack.c.bf16 %v1021_v17, %v1020_v18 }
 0xad1   :  { %v1369_v19 = vpop.eup %1368 }
 0xad2   :  { %v789_v44 = vmul.f32 %v1369_v19, %v787_v31  ;;  %v800_v20 = vmul.f32 %v1369_v19, %v798_v39  ;;  %v792_v24 = vsub.f32 1.0, %v1369_v19  ;;  %v1023_v31 = vld [vmem:[%s1764_s5 + $0x38] sm:$0xff] }
 0xad4   :  { %v790_v48 = vadd.f32 %v789_v44, %v1683_v62 }
 0xad6   :  { %1370 = vtanh.f32 %v790_v48 }
 0xae0   :  { %v1371_v21 = vpop.eup %1370 }
 0xae1   :  { %794 = vrot.lane.b32.xlu0 %v1371_v21, %s1461_s8 }
 0xb53   :  { %v795_v25 = vpop.permute.xlu0 %794 }
 0xb54   :  { %v797_v27 = vmul.f32 %v795_v25, %v792_v24 }
 0xb56   :  { %v801_v28 = vadd.f32 %v800_v20, %v797_v27  ;;  %v1141_v27 = vld [vmem:[%s1765_s6] ss:$0 sm:$0xff] }
 0xb58   :  { %v803_v29 = vrot.slane %v801_v28, 2  ;;  %v903_v42 = vrot.slane %v801_v28, 6 }
 0xb5a   :  { %806 = vrot.lane.b32.xlu1 %v803_v29, %s1461_s8  ;;  %v805_v30 = vmax.f32 %v699_v11, %v803_v29 }
 0xbcc   :  { %v807_v32 = vpop.permute.xlu1 %806 }
 0xbcd   :  { %1137 = vmatmul.mubr.msk.f32.vlgmr.msra.gmra.mrb[6].mxu1 %vm85_vm0, %v807_v32 }
 0xbce   :  { %1168 = vmatprep.mubr.msk.f32.mxu1 %vm1463_vm1, %v1460_v0  ;;  %v1022_v0 = vld [vmem:[%s1764_s5 + $0x30] sm:$0xff] }
 0xbcf   :  { %v1325_v39 = vpack.c.bf16 %v1023_v31, %v1022_v0 }
 0xca0   :  { %v876_v33 = vpop.f32.mrb[6].mxu1 }
 0xca1   :  { %v877_v34 = vadd.f32 %v876_v33, %v1588_v56  ;;  %v878_v35 = vpop.f32.mrb[7].mxu1 }
 0xca2   :  { %v879_v8 = vadd.f32 %v878_v35, %v1595_v5 }
 0xca3   :  { %v882_v36 = vrot.slane %v877_v34, 4 }
 0xca4   :  { %v892_v43 = vrot.slane %v879_v8, 4 }
 0xca5   :  { %v884_v37 = vadd.f32 %v882_v36, %v1676_v50 }
 0xca7   :  { %v1138_v38 = vmul.f32 -1.442695, %v884_v37 }
 0xca9   :  { %1372 = vpow2.f32 %v1138_v38 }
 0xcb3   :  { %v1373_v40 = vpop.eup %1372 }
 0xcb4   :  { %v888_v41 = vadd.f32 1.0, %v1373_v40 }
 0xcb6   :  { %1374 = vrcp.f32 %v888_v41 }
 0xcc0   :  { %v1375_v58 = vpop.eup %1374 }
 0xcc1   :  { %v894_v45 = vmul.f32 %v1375_v58, %v892_v43  ;;  %v905_v46 = vmul.f32 %v1375_v58, %v903_v42  ;;  %v897_v10 = vsub.f32 1.0, %v1375_v58 }
 0xcc3   :  { %v895_v47 = vadd.f32 %v894_v45, %v1683_v62 }
 0xcc5   :  { %1376 = vtanh.f32 %v895_v47 }
 0xccf   :  { %v1377_v49 = vpop.eup %1376 }
 0xcd0   :  { %899 = vrot.lane.b32.xlu0 %v1377_v49, %s1461_s8 }
 0xd42   :  { %v900_v51 = vpop.permute.xlu0 %899 }
 0xd43   :  { %v902_v52 = vmul.f32 %v900_v51, %v897_v10 }
 0xd45   :  { %v906_v53 = vadd.f32 %v905_v46, %v902_v52 }
 0xd47   :  { %v908_v54 = vrot.slane %v906_v53, 4  ;;  %v1008_v7 = vrot.slane %v906_v53, 6 }
 0xd49   :  { %911 = vrot.lane.b32.xlu1 %v908_v54, %s1461_s8  ;;  %v910_v57 = vmax.f32 %v805_v30, %v908_v54 }
 0xdbb   :  { %v912_v59 = vpop.permute.xlu1 %911 }
 0xdbc   :  { %1139 = vmatmul.mubr.msk.f32.vlgmr.msra.gmra.mrb[10].mxu0 %vm85_vm0, %v912_v59 }
 0xe8f   :  { %v981_v60 = vpop.f32.mrb[10].mxu0 }
 0xe90   :  { %v982_v61 = vadd.f32 %v981_v60, %v1588_v56  ;;  %v983_v63 = vpop.f32.mrb[11].mxu0  ;;  %v1016_v56 = vld [vmem:[%s1764_s5] sm:$0xff] }
 0xe91   :  { %v984_v4 = vadd.f32 %v983_v63, %v1595_v5  ;;  %v1018_v5 = vld [vmem:[%s1764_s5 + $0x10] sm:$0xff] }
 0xe92   :  { %v987_v55 = vrot.slane %v982_v61, 2 }
 0xe93   :  { %v997_v9 = vrot.slane %v984_v4, 2 }
 0xe94   :  { %v989_v22 = vadd.f32 %v987_v55, %v1676_v50  ;;  %v1017_v50 = vld [vmem:[%s1764_s5 + $0x8] sm:$0xff] }
 0xe95   :  { %v1316_v15 = vpack.c.bf16 %v1017_v50, %v1016_v56 }
 0xe96   :  { %v1140_v1 = vmul.f32 -1.442695, %v989_v22 }
 0xe97   :  { %1317 = vmatpush3.bf16.msra.mxu1 %v1316_v15 }
 0xe98   :  { %1378 = vpow2.f32 %v1140_v1  ;;  %1318 = vmatprep.subr.bf16.mxu1 %v1462_v14 }
 0xea2   :  { %v1379_v2 = vpop.eup %1378 }
 0xea3   :  { %v993_v3 = vadd.f32 1.0, %v1379_v2 }
 0xea5   :  { %1380 = vrcp.f32 %v993_v3 }
 0xeaf   :  { %v1381_v11 = vpop.eup %1380 }
 0xeb0   :  { %v999_v12 = vmul.f32 %v1381_v11, %v997_v9  ;;  %v1010_v6 = vmul.f32 %v1381_v11, %v1008_v7  ;;  %v1002_v19 = vsub.f32 1.0, %v1381_v11 }
 0xeb2   :  { %v1000_v23 = vadd.f32 %v999_v12, %v1683_v62  ;;  %v1019_v62 = vld [vmem:[%s1764_s5 + $0x18] sm:$0xff]  ;;  %s1464_s5 = smov [#allocation7]  }
 0xeb3   :  { %v1319_v13 = vpack.c.bf16 %v1019_v62, %v1018_v5  ;;  %s1114_s25 = sshll.u32 %s1464_s5, 4  ;;  %s1115_s25 = int_to_ptr.vmem [resolvable:$true] %s1114_s25 }
 0xeb4   :  { %1382 = vtanh.f32 %v1000_v23  ;;  %s1428_s3 = scalar_lea.vmem %s1115_s25, 32  ;;  %p1433_p3 = scmp.lt.s32.totalorder %s1115_s25, %s1115_s25 }
 0xeb5   :  { %1320 = vmatpush3.bf16.msra.mxu1 %v1319_v13  ;;  %p1429_p2 = scmp.ne.s32.totalorder %s1115_s25, %s1428_s3  ;;  %p1434_p4 = scmp.lt.s32.totalorder %s1428_s3, %s1428_s3 }
 0xeb6   :  { %1321 = vmatprep.subr.bf16.mxu1 %v1462_v14 }
 0xeb7   :  { %p1435_p5 = por %p1434_p4, %p1433_p3 }
 0xeb9   :  { %1323 = vmatpush3.bf16.msra.mxu1 %v1322_v26  ;;  %p1436_p6 = pnand %p1435_p5, %p1429_p2 }
 0xeba   :  { %1324 = vmatprep.subr.bf16.mxu1 %v1462_v14 }
 0xebd   :  { %1326 = vmatpush3.bf16.msra.mxu1 %v1325_v39 }
 0xebe   :  { %v1383_v16 = vpop.eup %1382 }
 0xebf   :  { %1004 = vrot.lane.b32.xlu0 %v1383_v16, %s1461_s8 }
 0xf31   :  { %v1005_v44 = vpop.permute.xlu0 %1004 }
 0xf32   :  { %v1007_v20 = vmul.f32 %v1005_v44, %v1002_v19 }
 0xf34   :  { %v1011_v48 = vadd.f32 %v1010_v6, %v1007_v20 }
 0xf36   :  { %v1013_v21 = vrot.slane %v1011_v48, 6 }
 0xf38   :  { %v1015_v24 = vmax.f32 %v910_v57, %v1013_v21 }
 0xf3a   :  { %1032 = vrot.lane.b32.xlu1 %v1015_v24, %s1461_s8 }
 0xfac   :  { %v1033_v25 = vpop.permute.xlu1 %1032 }
 0xfad   :  { %1169 = vmatmul.mubr.msk.f32.vlgmr.msra.gmra.mrb[8].mxu1 %vm85_vm0, %v1033_v25 }
0x1080   :  { %v1102_v28 = vpop.f32.mrb[8].mxu1 }
0x1081   :  { %v1103_v29 = vadd.f32 %v1141_v27, %v1102_v28  ;;  %v1170_v30 = vpop.f32.mrb[9].mxu1 }
0x1083   :  { %1107 = vst.msk [vmem:[#allocation7] sm:$0x3] %vm1106_vm2, %v1103_v29 }
0x1084   :  { %1439 = shalt.err (!%p1436_p6)
}
0x1085   :  { %s1440_s28 = scalar_lea.hbm %s1766_s7, 32 }
0x1086   :  { %p1441_p7 = scmp.ne.s32.totalorder %s1766_s7, %s1440_s28  ;;  %p1444_p8 = scmp.lt.u32.totalorder %s1440_s28, %s1766_s7 }
0x1088   :  { %p1446_p9 = pnand %p1444_p8, %p1441_p7 }
0x108a   :  { %1449 = shalt.err (!%p1446_p9)
}
0x108b   :  { %1117 = dma.vmem_to_hbm [thread:$0]  %s1115_s25, 32, %s1766_s7, [#allocation4]  }
0x108c   :  { %1454 = dma.done.wait [#allocation4], 32  }
0x108d   :  { %1455 = vsyncadd [#allocation4], 4294967264 }
0x108e   :  { %1121 = vsyncpa [#allocation3], 1 }
0x108f   :  { %1122 = vsyncpa [#allocation6], 1 }
0x1090   :  { %1123 = vsyncpa [#allocation4], 1 }

</bundles_post_ra>
